<compile_context>
chip_gen: v7x
topology: tpu7x:2x2x1
jax: 0.10.0
libtpu: 0.0.40
codegen_flags: <defaults>
</compile_context>

<pallas_src>
import math

import jax
import jax.numpy as jnp
from jax.experimental import pallas as pl
from jax.experimental.pallas import tpu as pltpu


def _dma_identity_kernel(x_hbm_ref, o_hbm_ref, sem):
    # Whole-array HBM -> HBM copy; no VMEM staging, no compute.
    copy = pltpu.make_async_copy(x_hbm_ref, o_hbm_ref, sem)
    copy.start()
    copy.wait()


def print_layer(x: jax.Array, verbose: bool = True, force_kernel: bool = False) -> jax.Array:
    """Pallas equivalent of PrintLayer.forward.

    Default path: print shape (side effect) and return x unchanged (no kernel,
    zero HBM traffic).  `force_kernel=True` routes the tensor through a single
    whole-array HBM->HBM DMA pallas_call for API-parity / debugging.
    """
    if verbose:
        # Shape is static in JAX.  Note: under jit this prints once at trace
        # time, not on every call (unlike torch's per-forward print).
        # TODO(synk): use jax.debug.print if strict per-call printing is needed.
        print(tuple(x.shape))

    if not force_kernel:
        # Hot path: identity op, no kernel, no HBM round-trip.
        return x

    total = math.prod(x.shape) if x.shape else 1
    if total == 0 or x.ndim == 0:
        # Degenerate cases: nothing meaningful to DMA; identity is exact.
        return x

    itemsize = jnp.dtype(x.dtype).itemsize

    return pl.pallas_call(
        _dma_identity_kernel,
        out_shape=jax.ShapeDtypeStruct(x.shape, x.dtype),
        in_specs=[pl.BlockSpec(memory_space=pl.ANY)],
        out_specs=pl.BlockSpec(memory_space=pl.ANY),
        scratch_shapes=[pltpu.SemaphoreType.DMA(())],
        cost_estimate=pl.CostEstimate(
            flops=0,
            transcendentals=0,
            bytes_accessed=2 * total * itemsize,
        ),
    )(x)


if __name__ == "__main__":
    key = jax.random.PRNGKey(0)
    # Small NCHW input consistent with how PrintLayer is used inside conv nets.
    x = jax.random.normal(key, (2, 4, 16, 16), dtype=jnp.float32)

    # Production path: print shape, return x directly (no kernel).
    y_fast = print_layer(x, verbose=True)
    assert y_fast is x

    # Debug / API-parity path: route through the whole-array HBM->HBM DMA kernel.
    y = jax.block_until_ready(print_layer(x, verbose=False, force_kernel=True))
    assert y.shape == x.shape
    assert y.dtype == x.dtype
    assert bool(jnp.all(y == x))

    # Ragged case (total not a multiple of 128) + sub-32-bit dtype, via kernel.
    # No pad / slice needed: the DMA copies the native shape directly.
    x2 = jax.random.normal(jax.random.PRNGKey(0), (3, 5, 7), dtype=jnp.bfloat16)
    y2 = jax.block_until_ready(print_layer(x2, verbose=False, force_kernel=True))
    assert y2.shape == x2.shape
    assert y2.dtype == x2.dtype
    assert bool(jnp.all(y2 == x2))

    print("KERNEL_OK")
</pallas_src>

<mosaic_0001>
module attributes {stable_mosaic.version = 11 : i64} {
  func.func @_dma_identity_kernel(%arg0: memref<2x4x16x16xf32, #tpu.memory_space<any>>, %arg1: memref<2x4x16x16xf32, #tpu.memory_space<any>>, %arg2: memref<!tpu.dma_semaphore, #tpu.memory_space<semaphore_mem>>) attributes {dimension_semantics = [], scalar_prefetch = 0 : i64, scratch_operands = 1 : i64, tpu.core_type = #tpu.core_type<tc>} {
    tpu.enqueue_dma source(%arg0 : memref<2x4x16x16xf32, #tpu.memory_space<any>>) target(%arg1 : memref<2x4x16x16xf32, #tpu.memory_space<any>>) target_semaphore(%arg2 : memref<!tpu.dma_semaphore, #tpu.memory_space<semaphore_mem>>)
    tpu.wait_dma2 semaphore(%arg2 : memref<!tpu.dma_semaphore, #tpu.memory_space<semaphore_mem>>) src(%arg0 : memref<2x4x16x16xf32, #tpu.memory_space<any>>) dst(%arg1 : memref<2x4x16x16xf32, #tpu.memory_space<any>>)
    return
  }
}

</mosaic_0001>

<bundles_post_ra>
// kernel: tpu_custom_call.1
= control target key start
LH: loop header
LB: loop body
LE: loop exit
PB: predicated region body
PF: predicated region fallthrough
CT: control target
= control target key end

     0   :  { %s36_s6 = smov [#allocation2]   ;;  %s37_s7 = smov [#allocation3]   ;;  %s55_s0 = inlined_call_operand.hbm [shape: f32[2,4,16,16], index: 0, kind: input, shape index: {}]   ;;  %s56_s1 = inlined_call_operand.hbm [shape: f32[2,4,16,16], index: 1, kind: output, shape index: {}]  }
   0x1   :  { %s38_s8 = smov 0  }
   0x2   :  { %18 = dma.general %s55_s0, 2048, %s56_s1, %s36_s6, %s37_s7, [#allocation4], %s38_s8, 0  }
   0x3   :  { %34 = dma.done.wait [#allocation2], 2048 }
   0x4   :  { %35 = vsyncadd [#allocation2], 4294965248 }
   0x5   :  { %24 = vsyncmov [#allocation2] }
   0x8   :  { %s25_s13 = vpop.sfrf %24 }
   0x9   :  { %p30_p0 = scmp.ne.s32.totalorder %s25_s13, 0 }
   0xb   :  { %29 = shalt.err (%p30_p0)  }

</bundles_post_ra>
